<compile_context>
chip_gen: v7x
topology: tpu7x:2x2x1
jax: 0.10.0
libtpu: 0.0.40
codegen_flags: <defaults>
</compile_context>

<pallas_src>
import functools
import warnings

import jax
import jax.numpy as jnp
from jax.experimental import pallas as pl
from jax.experimental.pallas import tpu as pltpu

BN_EPS = 1e-5
SN_EPS = 1e-12


def _cbn_kernel(x_ref, gamma_ref, beta_ref, o_ref,
                sum_ref, ssq_ref, scale_ref, shift_ref,
                *, inv_count, t_tile, t_valid, mask_last):
    # x_ref:     (B, Cb, Tt)
    # gamma_ref: (B, Cb, 1)   float32
    # beta_ref:  (B, Cb, 1)   float32
    # o_ref:     (B, Cb, Tt)
    phase = pl.program_id(1)
    t = pl.program_id(2)
    n_t = pl.num_programs(2)

    @pl.when(phase == 0)
    def _stats_pass():
        @pl.when(t == 0)
        def _init():
            sum_ref[...] = jnp.zeros_like(sum_ref)
            ssq_ref[...] = jnp.zeros_like(ssq_ref)
            # The output window is parked on block (c, 0) for the whole of
            # phase 0; write it once so every visited output block is written
            # (robust to write-back policy changes; VMEM store only, and the
            # real values overwrite it in phase 1 before any HBM flush).
            o_ref[...] = jnp.zeros_like(o_ref)

        x = x_ref[...].astype(jnp.float32)                       # (B, Cb, Tt)
        if mask_last:  # static flag: only emitted when T % t_tile != 0
            lane = (jax.lax.broadcasted_iota(jnp.int32, x.shape, 2)
                    + t * t_tile)
            x = jnp.where(lane < t_valid, x, 0.0)
        # one-pass accumulation into per-channel VMEM scratch
        sum_ref[...] += jnp.sum(x, axis=(0, 2), keepdims=True)    # (1, Cb, 1)
        ssq_ref[...] += jnp.sum(x * x, axis=(0, 2), keepdims=True)

        @pl.when(t == n_t - 1)
        def _finalize():
            mean = sum_ref[...] * inv_count                       # (1, Cb, 1)
            # One-pass var = E[x^2] - mean^2 in f32; clamped so cancellation on
            # strongly off-center inputs can't feed a negative value to rsqrt.
            # TODO(synk): shifted one-pass / Welford if inputs are far from
            # zero-mean relative to their std.
            var = jnp.maximum(ssq_ref[...] * inv_count - mean * mean, 0.0)
            rstd = jax.lax.rsqrt(var + BN_EPS)                    # EUP slot
            scale = gamma_ref[...].astype(jnp.float32) * rstd     # (B, Cb, 1)
            scale_ref[...] = scale
            shift_ref[...] = beta_ref[...].astype(jnp.float32) - mean * scale

    @pl.when(phase == 1)
    def _normalize_pass():
        x = x_ref[...].astype(jnp.float32)
        o_ref[...] = (x * scale_ref[...] + shift_ref[...]).astype(o_ref.dtype)


def _vmem_budget():
    """Generation-aware VMEM budgeting with headroom.

    v7x: 64 MiB/TC, v5e/v6e: 128 MiB.  The kernel is HBM-bound and saturates
    the roofline well before huge tiles, so never ask for more than 80 MiB and
    keep ~25% headroom for Mosaic internal scratch / neighbouring ops."""
    cap = None
    try:
        info = pltpu.get_tpu_info()
        cap = int(getattr(info, "vmem_capacity_bytes", 0)) or None
    except Exception as e:  # pragma: no cover
        warnings.warn(
            "pltpu.get_tpu_info() failed (%r); assuming 64 MiB VMEM "
            "(conservative: halves the budget on v5e/v6e)." % (e,))
    if cap is None:
        cap = 64 * 1024 * 1024
    vmem_limit = int(min(cap * 3 // 4, 80 * 1024 * 1024))
    # Budget for the pipelined x / out / gamma / beta blocks + scratch; leave
    # a further slice of the scoped limit for compiler-internal scratch.
    block_budget = max(vmem_limit - 4 * 1024 * 1024, 2 * 1024 * 1024)
    return vmem_limit, block_budget


def _choose_tiling(B, C, T, itemsize, budget):
    """Pick (c_tile, t_tile, n_t).

    Preference order (per perf review):
      1. t_tile == T: the x block index is then identical for both phases, so
         Pallas skips the phase-1 re-DMA and x is read from HBM exactly once.
         Shrink c_tile (sublane-aligned) first to make the slab fit.
      2. Otherwise stream T in 128-multiple tiles (capped at 2048 lanes) with
         the smallest aligned channel tile; x is read twice in that regime.
    Channel tiles are multiples of the dtype sublane packing and we prefer
    n_c >= 2 so both v7x TensorCores get work on the 'parallel' channel axis.
    """
    sub = {4: 8, 2: 16, 1: 32}.get(itemsize, 8)
    cands = sorted({c for c in range(sub, C + 1, sub) if C % c == 0} | {C})

    def block_bytes(c_tile, t_tile):
        xo = 4 * B * c_tile * t_tile * itemsize            # 2x in + 2x out bufs
        # double-buffered gamma/beta blocks + scale/shift + sum/ssq scratch (f32)
        small = 4 * c_tile * (4 * B + 2 * B + 2)
        return xo + small

    # 1) single-T-block path (x read from HBM once)
    fitting = [c for c in cands if block_bytes(c, T) <= budget]
    if fitting:
        split = [c for c in fitting if C // c >= 2]
        c_tile = max(split) if split else max(fitting)
        return c_tile, T, 1

    # 2) streaming fallback: smallest aligned channel tile, tile T
    c_tile = min(cands)
    max_t = budget // (4 * B * c_tile * itemsize)
    t_tile = max(128, min(2048, (max_t // 128) * 128))
    t_tile = min(t_tile, pl.cdiv(T, 128) * 128)
    return c_tile, t_tile, pl.cdiv(T, t_tile)


def spectral_norm_weight(w, u):
    """One power iteration + weight scaling, matching torch spectral_norm in
    training mode (n_power_iterations=1, eps=1e-12).  Returns the normalized
    weight AND the updated power-iteration vector so callers can thread `u`
    across forward passes like PyTorch's in-place buffer update."""
    def _normalize(v):
        return v / (jnp.linalg.norm(v) + SN_EPS)

    v = _normalize(w.T @ u)          # (in,)
    u_new = _normalize(w @ v)        # (out,)
    sigma = u_new @ (w @ v)
    return w / sigma, u_new


def conditional_batch_norm_1d(x, noise, w_sn, bias, *, tile_override=None):
    """x: (B, C, T), noise: (B, Z), w_sn: (2C, Z) spectral-normalized, bias: (2C,)."""
    B, C, T = x.shape
    dtype = x.dtype
    itemsize = jnp.dtype(dtype).itemsize

    # --- hoisted conditional projection (tiny; far below one MXU tile) ---
    gb = (noise.astype(jnp.float32) @ w_sn.T.astype(jnp.float32)
          + bias.astype(jnp.float32))                          # (B, 2C)
    gamma = gb[:, :C].reshape(B, C, 1)                          # (B, C, 1) f32
    beta = gb[:, C:].reshape(B, C, 1)                           # (B, C, 1) f32

    # --- generation-aware tiling (no wrapper-level pad/slice copies) ---
    vmem_limit, budget = _vmem_budget()
    if tile_override is not None:
        c_tile, t_tile = tile_override
        n_t = pl.cdiv(T, t_tile)
    else:
        c_tile, t_tile, n_t = _choose_tiling(B, C, T, itemsize, budget)
    n_c = pl.cdiv(C, c_tile)
    mask_last = (T % t_tile) != 0
    grid = (n_c, 2, n_t)

    kernel = functools.partial(
        _cbn_kernel, inv_count=float(1.0 / (B * T)),
        t_tile=t_tile, t_valid=T, mask_last=mask_last)

    elem = B * C * T
    x_reads = (1 if n_t == 1 else 2) * elem * itemsize
    cost = pl.CostEstimate(
        flops=6 * elem,
        transcendentals=C,
        bytes_accessed=x_reads + elem * itemsize + 2 * B * C * 4,
    )

    out = pl.pallas_call(
        kernel,
        out_shape=jax.ShapeDtypeStruct((B, C, T), dtype),
        grid=grid,
        in_specs=[
            # Same block index for both phases when n_t == 1 -> no re-DMA.
            pl.BlockSpec((B, c_tile, t_tile), lambda c, p, t: (0, c, t)),
            pl.BlockSpec((B, c_tile, 1), lambda c, p, t: (0, c, 0)),
            pl.BlockSpec((B, c_tile, 1), lambda c, p, t: (0, c, 0)),
        ],
        # phase 0 parks the output window on block (c, 0) (written defensively
        # with zeros); phase 1 visits every T block once and writes the final
        # values before any block-index change flushes to HBM.
        out_specs=pl.BlockSpec((B, c_tile, t_tile), lambda c, p, t: (0, c, t * p)),
        scratch_shapes=[
            pltpu.VMEM((1, c_tile, 1), jnp.float32),   # running per-channel sum
            pltpu.VMEM((1, c_tile, 1), jnp.float32),   # running per-channel sum of squares
            pltpu.VMEM((B, c_tile, 1), jnp.float32),   # fused scale = gamma * rsqrt(var+eps)
            pltpu.VMEM((B, c_tile, 1), jnp.float32),   # fused shift = beta - mean * scale
        ],
        compiler_params=pltpu.CompilerParams(
            dimension_semantics=("parallel", "arbitrary", "arbitrary"),
            vmem_limit_bytes=vmem_limit,
        ),
        cost_estimate=cost,
    )(x, gamma, beta)
    return out


def _reference(x, noise, w_sn, bias):
    C = x.shape[1]
    mean = jnp.mean(x, axis=(0, 2), keepdims=True)
    var = jnp.mean((x - mean) ** 2, axis=(0, 2), keepdims=True)
    x_hat = (x - mean) / jnp.sqrt(var + BN_EPS)
    gb = noise @ w_sn.T + bias
    gamma = gb[:, :C][:, :, None]
    beta = gb[:, C:][:, :, None]
    return gamma * x_hat + beta


if __name__ == "__main__":
    key = jax.random.PRNGKey(0)
    keys = jax.random.split(key, 8)

    # --- primary config (small shapes; hits the single-T-block fused-read path) ---
    B, C, T, Z = 2, 4, 16, 32
    x = jax.random.normal(keys[0], (B, C, T), dtype=jnp.float32)
    noise = jax.random.normal(keys[1], (B, Z), dtype=jnp.float32)
    # Linear(Z, 2C) with weight ~ N(1, 0.02), bias = 0, wrapped in spectral_norm.
    w_orig = 1.0 + 0.02 * jax.random.normal(keys[2], (2 * C, Z), dtype=jnp.float32)
    bias = jnp.zeros((2 * C,), dtype=jnp.float32)
    u0 = jax.random.normal(keys[3], (2 * C,), dtype=jnp.float32)
    u0 = u0 / (jnp.linalg.norm(u0) + SN_EPS)
    w_sn, _u_next = spectral_norm_weight(w_orig, u0)   # glue: weight prep, not hot path

    out = conditional_batch_norm_1d(x, noise, w_sn, bias)
    jax.block_until_ready(out)
    ref = _reference(x, noise, w_sn, bias)
    assert jnp.allclose(out, ref, atol=2e-4, rtol=2e-4), "mismatch vs reference"

    # --- second config: force the streaming + masked-ragged-tail fallback path ---
    B2, C2, T2, Z2 = 2, 8, 200, 16
    x2 = jax.random.normal(keys[4], (B2, C2, T2), dtype=jnp.float32)
    noise2 = jax.random.normal(keys[5], (B2, Z2), dtype=jnp.float32)
    w2 = 1.0 + 0.02 * jax.random.normal(keys[6], (2 * C2, Z2), dtype=jnp.float32)
    b2 = jnp.zeros((2 * C2,), dtype=jnp.float32)
    u2 = jax.random.normal(keys[7], (2 * C2,), dtype=jnp.float32)
    u2 = u2 / (jnp.linalg.norm(u2) + SN_EPS)
    w2_sn, _ = spectral_norm_weight(w2, u2)

    out2 = conditional_batch_norm_1d(x2, noise2, w2_sn, b2, tile_override=(8, 128))
    jax.block_until_ready(out2)
    ref2 = _reference(x2, noise2, w2_sn, b2)
    assert jnp.allclose(out2, ref2, atol=2e-4, rtol=2e-4), \
        "mismatch vs reference (streaming/masked path)"

    print("KERNEL_OK")
</pallas_src>

<mosaic_0001>
module attributes {stable_mosaic.version = 11 : i64} {
  func.func @_cbn_kernel(%arg0: i32, %arg1: i32, %arg2: i32, %arg3: memref<2x4x16xf32, #tpu.memory_space<vmem>>, %arg4: memref<2x4x1xf32, #tpu.memory_space<vmem>>, %arg5: memref<2x4x1xf32, #tpu.memory_space<vmem>>, %arg6: memref<2x4x16xf32, #tpu.memory_space<vmem>>, %arg7: memref<1x4x1xf32, #tpu.memory_space<vmem>>, %arg8: memref<1x4x1xf32, #tpu.memory_space<vmem>>, %arg9: memref<2x4x1xf32, #tpu.memory_space<vmem>>, %arg10: memref<2x4x1xf32, #tpu.memory_space<vmem>>) attributes {dimension_semantics = [#tpu.dimension_semantics<parallel>, #tpu.dimension_semantics<arbitrary>, #tpu.dimension_semantics<arbitrary>], iteration_bounds = array<i64: 1, 2, 1>, scalar_prefetch = 0 : i64, scratch_operands = 4 : i64, tpu.core_type = #tpu.core_type<tc>, window_params = [{transform_indices = @transform_0, window_bounds = array<i64: 2, 4, 16>}, {transform_indices = @transform_1, window_bounds = array<i64: 2, 4, 1>}, {transform_indices = @transform_2, window_bounds = array<i64: 2, 4, 1>}, {transform_indices = @transform_3, window_bounds = array<i64: 2, 4, 16>}]} {
    %c0_i32 = arith.constant 0 : i32
    %0 = arith.cmpi eq, %arg1, %c0_i32 : i32
    %1 = arith.extui %0 : i1 to i32
    %c0_i32_0 = arith.constant 0 : i32
    %2 = arith.cmpi ne, %1, %c0_i32_0 : i32
    scf.if %2 {
      %c0_i32_2 = arith.constant 0 : i32
      %6 = arith.cmpi eq, %arg2, %c0_i32_2 : i32
      %7 = arith.extui %6 : i1 to i32
      %c0_i32_3 = arith.constant 0 : i32
      %8 = arith.cmpi ne, %7, %c0_i32_3 : i32
      scf.if %8 {
        %cst_21 = arith.constant 0.000000e+00 : f32
        %24 = vector.broadcast %cst_21 : f32 to vector<1x4x1xf32>
        %c0_22 = arith.constant 0 : index
        %c0_23 = arith.constant 0 : index
        %c0_24 = arith.constant 0 : index
        %25 = vector.load %arg7[%c0_22, %c0_23, %c0_24] : memref<1x4x1xf32, #tpu.memory_space<vmem>>, vector<1x4x1xf32>
        tpu.vector_store %arg7[%c0_22, %c0_23, %c0_24], %24 {strides = array<i32>} : memref<1x4x1xf32, #tpu.memory_space<vmem>>, vector<1x4x1xf32>,
        %cst_25 = arith.constant 0.000000e+00 : f32
        %26 = vector.broadcast %cst_25 : f32 to vector<1x4x1xf32>
        %c0_26 = arith.constant 0 : index
        %c0_27 = arith.constant 0 : index
        %c0_28 = arith.constant 0 : index
        %27 = vector.load %arg8[%c0_26, %c0_27, %c0_28] : memref<1x4x1xf32, #tpu.memory_space<vmem>>, vector<1x4x1xf32>
        tpu.vector_store %arg8[%c0_26, %c0_27, %c0_28], %26 {strides = array<i32>} : memref<1x4x1xf32, #tpu.memory_space<vmem>>, vector<1x4x1xf32>,
        %cst_29 = arith.constant 0.000000e+00 : f32
        %28 = vector.broadcast %cst_29 : f32 to vector<2x4x16xf32>
        %c0_30 = arith.constant 0 : index
        %c0_31 = arith.constant 0 : index
        %c0_32 = arith.constant 0 : index
        %29 = vector.load %arg6[%c0_30, %c0_31, %c0_32] : memref<2x4x16xf32, #tpu.memory_space<vmem>>, vector<2x4x16xf32>
        tpu.vector_store %arg6[%c0_30, %c0_31, %c0_32], %28 {strides = array<i32>} : memref<2x4x16xf32, #tpu.memory_space<vmem>>, vector<2x4x16xf32>,
      } else {
      }
      %c0 = arith.constant 0 : index
      %c0_4 = arith.constant 0 : index
      %c0_5 = arith.constant 0 : index
      %9 = vector.load %arg3[%c0, %c0_4, %c0_5] : memref<2x4x16xf32, #tpu.memory_space<vmem>>, vector<2x4x16xf32>
      %c0_6 = arith.constant 0 : index
      %c0_7 = arith.constant 0 : index
      %c0_8 = arith.constant 0 : index
      %10 = vector.load %arg7[%c0_6, %c0_7, %c0_8] : memref<1x4x1xf32, #tpu.memory_space<vmem>>, vector<1x4x1xf32>
      %cst = arith.constant dense<0.000000e+00> : vector<4xf32>
      %11 = vector.multi_reduction <add>, %9, %cst [0, 2] : vector<2x4x16xf32> to vector<4xf32>
      %12 = vector.shape_cast %11 : vector<4xf32> to vector<1x4x1xf32>
      %13 = arith.addf %10, %12 : vector<1x4x1xf32>
      %c0_9 = arith.constant 0 : index
      %c0_10 = arith.constant 0 : index
      %c0_11 = arith.constant 0 : index
      %14 = vector.load %arg7[%c0_9, %c0_10, %c0_11] : memref<1x4x1xf32, #tpu.memory_space<vmem>>, vector<1x4x1xf32>
      tpu.vector_store %arg7[%c0_9, %c0_10, %c0_11], %13 {strides = array<i32>} : memref<1x4x1xf32, #tpu.memory_space<vmem>>, vector<1x4x1xf32>,
      %c0_12 = arith.constant 0 : index
      %c0_13 = arith.constant 0 : index
      %c0_14 = arith.constant 0 : index
      %15 = vector.load %arg8[%c0_12, %c0_13, %c0_14] : memref<1x4x1xf32, #tpu.memory_space<vmem>>, vector<1x4x1xf32>
      %16 = arith.mulf %9, %9 : vector<2x4x16xf32>
      %cst_15 = arith.constant dense<0.000000e+00> : vector<4xf32>
      %17 = vector.multi_reduction <add>, %16, %cst_15 [0, 2] : vector<2x4x16xf32> to vector<4xf32>
      %18 = vector.shape_cast %17 : vector<4xf32> to vector<1x4x1xf32>
      %19 = arith.addf %15, %18 : vector<1x4x1xf32>
      %c0_16 = arith.constant 0 : index
      %c0_17 = arith.constant 0 : index
      %c0_18 = arith.constant 0 : index
      %20 = vector.load %arg8[%c0_16, %c0_17, %c0_18] : memref<1x4x1xf32, #tpu.memory_space<vmem>>, vector<1x4x1xf32>
      tpu.vector_store %arg8[%c0_16, %c0_17, %c0_18], %19 {strides = array<i32>} : memref<1x4x1xf32, #tpu.memory_space<vmem>>, vector<1x4x1xf32>,
      %c0_i32_19 = arith.constant 0 : i32
      %21 = arith.cmpi eq, %arg2, %c0_i32_19 : i32
      %22 = arith.extui %21 : i1 to i32
      %c0_i32_20 = arith.constant 0 : i32
      %23 = arith.cmpi ne, %22, %c0_i32_20 : i32
      scf.if %23 {
        %c0_21 = arith.constant 0 : index
        %c0_22 = arith.constant 0 : index
        %c0_23 = arith.constant 0 : index
        %24 = vector.load %arg7[%c0_21, %c0_22, %c0_23] : memref<1x4x1xf32, #tpu.memory_space<vmem>>, vector<1x4x1xf32>
        %cst_24 = arith.constant 3.125000e-02 : f32
        %25 = vector.broadcast %cst_24 : f32 to vector<1x4x1xf32>
        %26 = arith.mulf %24, %25 : vector<1x4x1xf32>
        %c0_25 = arith.constant 0 : index
        %c0_26 = arith.constant 0 : index
        %c0_27 = arith.constant 0 : index
        %27 = vector.load %arg8[%c0_25, %c0_26, %c0_27] : memref<1x4x1xf32, #tpu.memory_space<vmem>>, vector<1x4x1xf32>
        %cst_28 = arith.constant 3.125000e-02 : f32
        %28 = vector.broadcast %cst_28 : f32 to vector<1x4x1xf32>
        %29 = arith.mulf %27, %28 : vector<1x4x1xf32>
        %30 = arith.mulf %26, %26 : vector<1x4x1xf32>
        %31 = arith.subf %29, %30 : vector<1x4x1xf32>
        %cst_29 = arith.constant 0.000000e+00 : f32
        %32 = vector.broadcast %cst_29 : f32 to vector<1x4x1xf32>
        %33 = arith.maximumf %31, %32 : vector<1x4x1xf32>
        %cst_30 = arith.constant 9.99999974E-6 : f32
        %34 = vector.broadcast %cst_30 : f32 to vector<1x4x1xf32>
        %35 = arith.addf %33, %34 : vector<1x4x1xf32>
        %36 = math.rsqrt %35 : vector<1x4x1xf32>
        %c0_31 = arith.constant 0 : index
        %c0_32 = arith.constant 0 : index
        %c0_33 = arith.constant 0 : index
        %37 = vector.load %arg4[%c0_31, %c0_32, %c0_33] : memref<2x4x1xf32, #tpu.memory_space<vmem>>, vector<2x4x1xf32>
        %38 = vector.broadcast %36 : vector<1x4x1xf32> to vector<2x4x1xf32>
        %39 = arith.mulf %37, %38 : vector<2x4x1xf32>
        %c0_34 = arith.constant 0 : index
        %c0_35 = arith.constant 0 : index
        %c0_36 = arith.constant 0 : index
        %40 = vector.load %arg9[%c0_34, %c0_35, %c0_36] : memref<2x4x1xf32, #tpu.memory_space<vmem>>, vector<2x4x1xf32>
        tpu.vector_store %arg9[%c0_34, %c0_35, %c0_36], %39 {strides = array<i32>} : memref<2x4x1xf32, #tpu.memory_space<vmem>>, vector<2x4x1xf32>,
        %c0_37 = arith.constant 0 : index
        %c0_38 = arith.constant 0 : index
        %c0_39 = arith.constant 0 : index
        %41 = vector.load %arg5[%c0_37, %c0_38, %c0_39] : memref<2x4x1xf32, #tpu.memory_space<vmem>>, vector<2x4x1xf32>
        %42 = vector.broadcast %26 : vector<1x4x1xf32> to vector<2x4x1xf32>
        %43 = arith.mulf %42, %39 : vector<2x4x1xf32>
        %44 = arith.subf %41, %43 : vector<2x4x1xf32>
        %c0_40 = arith.constant 0 : index
        %c0_41 = arith.constant 0 : index
        %c0_42 = arith.constant 0 : index
        %45 = vector.load %arg10[%c0_40, %c0_41, %c0_42] : memref<2x4x1xf32, #tpu.memory_space<vmem>>, vector<2x4x1xf32>
        tpu.vector_store %arg10[%c0_40, %c0_41, %c0_42], %44 {strides = array<i32>} : memref<2x4x1xf32, #tpu.memory_space<vmem>>, vector<2x4x1xf32>,
      } else {
      }
    } else {
    }
    %c1_i32 = arith.constant 1 : i32
    %3 = arith.cmpi eq, %arg1, %c1_i32 : i32
    %4 = arith.extui %3 : i1 to i32
    %c0_i32_1 = arith.constant 0 : i32
    %5 = arith.cmpi ne, %4, %c0_i32_1 : i32
    scf.if %5 {
      %c0 = arith.constant 0 : index
      %c0_2 = arith.constant 0 : index
      %c0_3 = arith.constant 0 : index
      %6 = vector.load %arg3[%c0, %c0_2, %c0_3] : memref<2x4x16xf32, #tpu.memory_space<vmem>>, vector<2x4x16xf32>
      %c0_4 = arith.constant 0 : index
      %c0_5 = arith.constant 0 : index
      %c0_6 = arith.constant 0 : index
      %7 = vector.load %arg9[%c0_4, %c0_5, %c0_6] : memref<2x4x1xf32, #tpu.memory_space<vmem>>, vector<2x4x1xf32>
      %8 = vector.broadcast %7 : vector<2x4x1xf32> to vector<2x4x16xf32>
      %9 = arith.mulf %6, %8 : vector<2x4x16xf32>
      %c0_7 = arith.constant 0 : index
      %c0_8 = arith.constant 0 : index
      %c0_9 = arith.constant 0 : index
      %10 = vector.load %arg10[%c0_7, %c0_8, %c0_9] : memref<2x4x1xf32, #tpu.memory_space<vmem>>, vector<2x4x1xf32>
      %11 = vector.broadcast %10 : vector<2x4x1xf32> to vector<2x4x16xf32>
      %12 = arith.addf %9, %11 : vector<2x4x16xf32>
      %c0_10 = arith.constant 0 : index
      %c0_11 = arith.constant 0 : index
      %c0_12 = arith.constant 0 : index
      %13 = vector.load %arg6[%c0_10, %c0_11, %c0_12] : memref<2x4x16xf32, #tpu.memory_space<vmem>>, vector<2x4x16xf32>
      tpu.vector_store %arg6[%c0_10, %c0_11, %c0_12], %12 {strides = array<i32>} : memref<2x4x16xf32, #tpu.memory_space<vmem>>, vector<2x4x16xf32>,
    } else {
    }
    return
  }
  func.func @transform_0(%arg0: i32, %arg1: i32, %arg2: i32) -> (i32, i32, i32) {
    %c0_i32 = arith.constant 0 : i32
    %c0_i32_0 = arith.constant 0 : i32
    return %c0_i32, %arg0, %arg2 : i32, i32, i32
  }
  func.func @transform_1(%arg0: i32, %arg1: i32, %arg2: i32) -> (i32, i32, i32) {
    %c0_i32 = arith.constant 0 : i32
    %c0_i32_0 = arith.constant 0 : i32
    %c0_i32_1 = arith.constant 0 : i32
    return %c0_i32, %arg0, %c0_i32_0 : i32, i32, i32
  }
  func.func @transform_2(%arg0: i32, %arg1: i32, %arg2: i32) -> (i32, i32, i32) {
    %c0_i32 = arith.constant 0 : i32
    %c0_i32_0 = arith.constant 0 : i32
    %c0_i32_1 = arith.constant 0 : i32
    return %c0_i32, %arg0, %c0_i32_0 : i32, i32, i32
  }
  func.func @transform_3(%arg0: i32, %arg1: i32, %arg2: i32) -> (i32, i32, i32) {
    %0 = arith.muli %arg2, %arg1 : i32
    %c0_i32 = arith.constant 0 : i32
    %c0_i32_0 = arith.constant 0 : i32
    return %c0_i32, %arg0, %0 : i32, i32, i32
  }
}

</mosaic_0001>

<bundles_post_ra>
// kernel: tpu_custom_call.1
= control target key start
LH: loop header
LB: loop body
LE: loop exit
PB: predicated region body
PF: predicated region fallthrough
CT: control target
= control target key end

     0   :  { %8 = vsyncpa [#allocation7], 0  ;;  %s693_s0 = inlined_call_operand.vmem [shape: f32[2,4,16], index: 0, kind: input, shape index: {}]   ;;  %s694_s1 = inlined_call_operand.vmem [shape: f32[2,4,1], index: 1, kind: input, shape index: {}]   ;;  %s695_s2 = inlined_call_operand.vmem [shape: f32[2,4,1], index: 2, kind: input, shape index: {}]   ;;  %s696_s3 = inlined_call_operand.hbm [shape: f32[2,4,16], index: 3, kind: output, shape index: {}]  }
   0x1   :  { %10 = vsyncpa [#allocation7 + $0x1], 0  ;;  %s595_s12 = smov 0   ;;  %s597_s13 = smov 0  }
   0x2   :  { %s599_s14 = smov 0  }
   0x3 LB: > { %s459_s15 = sadd.s32 4294967295, %s568_s14   ;;  %s460_s16 = sadd.s32 4294967294, %s568_s14   ;;  %s568_s14 = sphi %s599_s14, %s16_s14   ;;  %s564_s13 = sphi %s597_s13, %s699_s13   ;;  %s560_s12 = sphi %s595_s12, %s698_s12  }
   0x4   : > { %s31_s17 = sadd.s32 1, %s564_s13  ;;  %p465_p0 = scmp.ge.s32.totalorder %s568_s14, 1 }
   0x5   : > { %p33_p1 = scmp.ge.s32.totalorder %s31_s17, 2  ;;  %p185_p2 = scmp.lt.s32.totalorder %s568_s14, 3 }
   0x7   : > { %s701_s17 = smov (%p33_p1, %s31_s17), 0  ;;  %p186_p3 = pnand %p465_p0, %p185_p2 }
   0x8   : > { %p466_p4 = scmp.ne.s32.totalorder (!%p186_p3), %s560_s12, 0 }
   0x9   : > { %189 = sbr.rel (%p186_p3) target bundleno = 368 (0x170), region = 32 }
  0x10   : > { %238 = sbr.rel (%p466_p4) target bundleno = 202 (0xca), region = 36  ;;  %vm246_vm0 = vcmask (!%p466_p4), 125952   ;;  %v249_v0 = vld [vmem:[%s693_s0] sm:$0xf] (!%p466_p4)  ;;  %v250_v1 = vld [vmem:[%s693_s0 + $0x4] sm:$0xf] (!%p466_p4) }
  0x11   : > { %v253_v2 = vsel (!%p466_p4), %vm246_vm0, %v249_v0, 0.0  ;;  %v254_v3 = vsel (!%p466_p4), %vm246_vm0, %v250_v1, 0.0  ;;  %v262_v4 = vmul.f32 (!%p466_p4), %v249_v0, %v249_v0  ;;  %v263_v5 = vmul.f32 (!%p466_p4), %v250_v1, %v250_v1  ;;  %v283_v25 = vld [vmem:[%s694_s1] sm:$0xf] (!%p466_p4)  ;;  %v284_v26 = vld [vmem:[%s694_s1 + $0x4] sm:$0xf] (!%p466_p4) }
  0x12   : > { %v255_v6 = vadd.f32 (!%p466_p4), %v254_v3, %v253_v2  ;;  %vm243_vm1 = vcmask (!%p466_p4), 3072   ;;  %v570_v10 = vmov (!%p466_p4), 0.0   ;;  %v289_v30 = vld [vmem:[%s695_s2] sm:$0xf] (!%p466_p4)  ;;  %v290_v31 = vld [vmem:[%s695_s2 + $0x4] sm:$0xf] (!%p466_p4) }
  0x13   : > { %v264_v7 = vsel (!%p466_p4), %vm246_vm0, %v262_v4, 0.0  ;;  %v265_v8 = vsel (!%p466_p4), %vm246_vm0, %v263_v5, 0.0  ;;  %244 = vst.msk [vmem:[#allocation2] sm:$0xf] (!%p466_p4), %vm243_vm1, %v570_v10  ;;  %245 = vst.msk [vmem:[#allocation3] sm:$0xf] (!%p466_p4), %vm243_vm1, %v570_v10 }
  0x14   : > { %256 = vadd.xlane.f32.xlu0 (!%p466_p4), %v255_v6  ;;  %v266_v9 = vadd.f32 (!%p466_p4), %v265_v8, %v264_v7  ;;  %247 = vst.msk [vmem:[#allocation6] sm:$0xf] (!%p466_p4), %vm246_vm0, %v570_v10  ;;  %248 = vst.msk [vmem:[#allocation6 + $0x4] sm:$0xf] (!%p466_p4), %vm246_vm0, %v570_v10 }
  0x18   : > { %267 = vadd.xlane.f32.xlu0 %v266_v9 }
  0x1a   : > { %v251_v11 = vld [vmem:[#allocation2] sm:$0xf]  ;;  %v261_v14 = vld [vmem:[#allocation3] sm:$0xf] }
  0xa1   : > { %v257_v12 = vpop.xlane.xlu0 %256 }
  0xa2   : > { %v258_v13 = vadd.f32 %v257_v12, %v251_v11 }
  0xa4   : > { %260 = vst.msk [vmem:[#allocation2] sm:$0xf] %vm243_vm1, %v258_v13 }
  0xa5   : > { %v268_v15 = vpop.xlane.xlu0 %267 }
  0xa6   : > { %v269_v16 = vadd.f32 %v268_v15, %v261_v14 }
  0xa8   : > { %270 = vst.msk [vmem:[#allocation3] sm:$0xf] %vm243_vm1, %v269_v16 }
  0xab   : > { %v274_v17 = vld [vmem:[#allocation2] sm:$0xf] }
  0xac   : > { %v275_v18 = vmul.f32 0.03125, %v274_v17 }
  0xae   : > { %v278_v21 = vmul.f32 %v275_v18, %v275_v18 }
  0xaf   : > { %v276_v19 = vld [vmem:[#allocation3] sm:$0xf] }
  0xb0   : > { %v277_v20 = vmul.f32 0.03125, %v276_v19 }
  0xb2   : > { %v279_v22 = vsub.f32 %v277_v20, %v278_v21 }
  0xb4   : > { %v280_v23 = vmax.f32 %v279_v22, 0.0 }
  0xb6   : > { %v281_v24 = vadd.f32 1e-05, %v280_v23 }
  0xb8   : > { %512 = vrsqrt.f32 %v281_v24 }
  0xc2   : > { %v513_v27 = vpop.eup %512 }
  0xc3   : > { %v285_v28 = vmul.f32 %v513_v27, %v283_v25  ;;  %v286_v29 = vmul.f32 %v513_v27, %v284_v26 }
  0xc5   : > { %287 = vst.msk [vmem:[#allocation4] sm:$0xf] %vm243_vm1, %v285_v28  ;;  %288 = vst.msk [vmem:[#allocation4 + $0x4] sm:$0xf] %vm243_vm1, %v286_v29  ;;  %v291_v32 = vmul.f32 %v285_v28, %v275_v18  ;;  %v292_v33 = vmul.f32 %v286_v29, %v275_v18 }
  0xc7   : > { %v293_v34 = vsub.f32 %v289_v30, %v291_v32  ;;  %v294_v35 = vsub.f32 %v290_v31, %v292_v33 }
  0xc9   : > { %295 = vst.msk [vmem:[#allocation5] sm:$0xf] %vm243_vm1, %v293_v34  ;;  %296 = vst.msk [vmem:[#allocation5 + $0x4] sm:$0xf] %vm243_vm1, %v294_v35 }
  0xca PF: > { %p467_p5 = scmp.ne.s32.totalorder %s560_s12, 1 }
  0xcb   : > { %v571_v38 = vmov (!%p467_p5), 0   ;;  %v301_v41 = vld [vmem:[%s693_s0] sm:$0xf] (!%p467_p5)  ;;  %vm331_vm2 = vcmask (!%p467_p5), 125952   ;;  %v302_v45 = vld [vmem:[%s693_s0 + $0x4] sm:$0xf] (!%p467_p5) }
  0xcc   : > { %300 = sbr.rel (%p467_p5) target bundleno = 344 (0x158), region = 48  ;;  %v303_v37 = vld [vmem:[#allocation4] sm:$0xf] (!%p467_p5)  ;;  %515 = vset.pattern.permute.xlu1 (!%p467_p5), %v571_v38  ;;  %514 = vset.pattern.permute.xlu0 (!%p467_p5), %v571_v38  ;;  %v304_v40 = vld [vmem:[#allocation4 + $0x4] sm:$0xf] (!%p467_p5) }
  0xcd   : > { %307 = vperm.xlu0 (!%p467_p5), %514, %v303_v37  }
  0xd0   : > { %v317_v36 = vld [vmem:[#allocation5] sm:$0xf] (!%p467_p5)  ;;  %v318_v39 = vld [vmem:[#allocation5 + $0x4] sm:$0xf] (!%p467_p5) }
  0xd1   : > { %321 = vperm.xlu1 (!%p467_p5), %515, %v317_v36   ;;  %312 = vperm.xlu0 (!%p467_p5), %514, %v304_v40  }
  0xd5   : > { %326 = vperm.xlu1 %515, %v318_v39  }
 0x14c   : > { %v308_v43 = vpop.permute.xlu0 %307 }
 0x14d   : > { %v315_v44 = vmul.f32 %v308_v43, %v301_v41 }
 0x150   : > { %v322_v42 = vpop.permute.xlu1 %321  ;;  %v313_v47 = vpop.permute.xlu0 %312 }
 0x151   : > { %v329_v46 = vadd.f32 %v322_v42, %v315_v44  ;;  %v316_v48 = vmul.f32 %v313_v47, %v302_v45 }
 0x153   : > { %332 = vst.msk [vmem:[#allocation6] sm:$0xf] %vm331_vm2, %v329_v46 }
 0x154   : > { %v327_v49 = vpop.permute.xlu1 %326 }
 0x155   : > { %v330_v50 = vadd.f32 %v327_v49, %v316_v48 }
 0x157   : > { %333 = vst.msk [vmem:[#allocation6 + $0x4] sm:$0xf] %vm331_vm2, %v330_v50 }
 0x158 PF: > { %p659_p6 = scmp.eq.s32.totalorder %s459_s15, 1  ;;  %s572_s8 = smov [#allocation6]  }
 0x159   : > { %s349_s9 = sshll.u32 %s572_s8, 4  ;;  %s350_s9 = int_to_ptr.vmem [resolvable:$true] %s349_s9 }
 0x15a   : > { %s516_s10 = scalar_lea.vmem %s350_s9, 128  ;;  %s522_s11 = scalar_lea.vmem %s350_s9, 256 }
 0x15b   : > { %p517_p7 = scmp.ne.s32.totalorder %s350_s9, %s516_s10  ;;  %p523_p10 = scmp.lt.s32.totalorder %s350_s9, %s350_s9 }
 0x15c   : > { %p524_p11 = scmp.lt.s32.totalorder %s522_s11, %s516_s10 }
 0x15d   : > { %p518_p8 = pnand %p517_p7, %p659_p6 }
 0x15e   : > { %p525_p12 = por %p524_p11, %p523_p10 }
 0x15f   : > { %p519_p9 = pneg %p518_p8 }
 0x161   : > { %p526_p13 = pnand %p525_p12, %p519_p9 }
 0x163   : > { %529 = shalt.err (!%p526_p13)
}
 0x164   : > { %s530_s18 = scalar_lea.hbm %s696_s3, 128 }
 0x165   : > { %p531_p0 = scmp.ne.s32.totalorder %s696_s3, %s530_s18  ;;  %p536_p3 = scmp.lt.u32.totalorder %s530_s18, %s696_s3 }
 0x167   : > { %p532_p1 = pnand %p531_p0, %p659_p6 }
 0x169   : > { %p533_p2 = pneg %p532_p1 }
 0x16b   : > { %p538_p4 = pnand %p536_p3, %p533_p2 }
 0x16d   : > { %541 = shalt.err (!%p538_p4)
}
 0x16e   : > { %s573_s23 = smov 64   ;;  %s574_s24 = smov 4  }
 0x16f   : > { %473 = dma.vmem_to_hbm [thread:$0]  (%p659_p6), %s350_s9, 128, %s696_s3, [#allocation7], %s573_s23, %s573_s23, %s574_s24  }
 0x170 PF: > { %p481_p5 = scmp.ge.s32.totalorder %s568_s14, 2  ;;  %p482_p7 = scmp.eq.s32.totalorder %s460_s16, 1 }
 0x172   : > { %p477_p8 = pnand %p482_p7, %p481_p5 }
 0x174   : > { %555 = dma.done.wait (!%p477_p8), [#allocation7], 128  }
 0x175   : > { %557 = vsyncadd (!%p477_p8), [#allocation7], 4294967168  ;;  %s16_s14 = sadd.s32 1, %s568_s14   ;;  %s698_s12 = smov %s564_s13 }
 0x176   : > { %p13_p9 = scmp.ge.s32.totalorder %s16_s14, 4   ;;  %s699_s13 = smov %s701_s17 }
 0x178   :  { %15 = sbr.rel (!%p13_p9) target bundleno = 3 (0x3), region = 89 }
 0x17f   :  { %370 = vsyncpa [#allocation7], 1 }
 0x180   :  { %372 = vsyncpa [#allocation7 + $0x1], 1 }

</bundles_post_ra>
